<compile_context>
chip_gen: v5e
topology: v5e:2x2
jax: 0.10.0
libtpu: 0.0.40
codegen_flags: <defaults>
</compile_context>

<pallas_src>
import functools

import jax
import jax.numpy as jnp
from jax.experimental import pallas as pl
from jax.experimental.pallas import tpu as pltpu


def _elu(x):
    # ELU(alpha=1): x if x > 0 else exp(x) - 1 (clamp exp arg in the unused branch)
    return jnp.where(x > 0, x, jnp.exp(jnp.minimum(x, 0.0)) - 1.0)


def _compute_logits(state_ref, det_ref, w1s_ref, w1d_ref, b1_ref, wl_ref):
    # h = ELU(state @ W1s + det @ W1d + b1)
    h = (jnp.dot(state_ref[...], w1s_ref[...], preferred_element_type=jnp.float32)
         + jnp.dot(det_ref[...], w1d_ref[...], preferred_element_type=jnp.float32)
         + b1_ref[...])
    h = _elu(h)
    hdim = wl_ref.shape[0] - 1               # static at trace time
    w23 = wl_ref[0:hdim, :]                  # (H, A), 8-aligned static slice
    b23 = wl_ref[hdim:hdim + 1, :]           # (1, A), 8-aligned static slice
    return jnp.dot(h, w23, preferred_element_type=jnp.float32) + b23


def actor_train_kernel(state_ref, det_ref, g_ref, w1s_ref, w1d_ref, b1_ref, wl_ref,
                       sample_ref, probs_ref):
    logits = _compute_logits(state_ref, det_ref, w1s_ref, w1d_ref, b1_ref, wl_ref)

    # softmax probs (OneHotCategorical.probs)
    m = jnp.max(logits, axis=-1, keepdims=True)
    e = jnp.exp(logits - m)
    probs = e / jnp.sum(e, axis=-1, keepdims=True)

    # tie-safe Gumbel-max one-hot sample (argmax via iota + min keeps it exactly one-hot)
    z = logits + g_ref[...]
    zmax = jnp.max(z, axis=-1, keepdims=True)
    ids = jax.lax.broadcasted_iota(jnp.int32, z.shape, 1)
    sentinel = jnp.int32(z.shape[-1])
    idx = jnp.min(jnp.where(z == zmax, ids, sentinel), axis=-1, keepdims=True)

    sample_ref[...] = (ids == idx).astype(jnp.float32)
    probs_ref[...] = probs


def actor_eval_kernel(state_ref, det_ref, w1s_ref, w1d_ref, b1_ref, wl_ref, idx_ref):
    logits = _compute_logits(state_ref, det_ref, w1s_ref, w1d_ref, b1_ref, wl_ref)
    m = jnp.max(logits, axis=-1, keepdims=True)
    ids = jax.lax.broadcasted_iota(jnp.int32, logits.shape, 1)
    sentinel = jnp.int32(logits.shape[-1])
    idx_ref[...] = jnp.min(jnp.where(logits == m, ids, sentinel),
                           axis=-1, keepdims=True)


_VMEM = pl.BlockSpec(memory_space=pltpu.MemorySpace.VMEM)


@functools.partial(jax.jit, static_argnames=("training",))
def action_discrete_forward(packed_params, state, deterministic, rng_key, training=True):
    """Pallas-backed forward pass of ActionDiscrete.

    packed_params: (w1s, w1d, b1, wl) from pack_params().
    state:         (B, S) f32;  deterministic: (B, D) f32;  rng_key: jax PRNG key.
    returns: (B, A) f32 straight-through one-hot action if training,
             (B,)   i32 argmax indices otherwise (torch returns int64).
    """
    w1s, w1d, b1, wl = packed_params
    B = state.shape[0]
    A = wl.shape[1]

    if training:
        gumbel = jax.random.gumbel(rng_key, (B, A), dtype=jnp.float32)
        sample, probs = pl.pallas_call(
            actor_train_kernel,
            out_shape=(jax.ShapeDtypeStruct((B, A), jnp.float32),
                       jax.ShapeDtypeStruct((B, A), jnp.float32)),
            in_specs=[_VMEM] * 7,
            out_specs=(_VMEM, _VMEM),
        )(state, deterministic, gumbel, w1s, w1d, b1, wl)
        # straight-through estimator applied outside the kernel
        # (forward value == sample exactly; probs - stop_grad(probs) == 0)
        return sample + probs - jax.lax.stop_gradient(probs)

    idx = pl.pallas_call(
        actor_eval_kernel,
        out_shape=jax.ShapeDtypeStruct((B, 1), jnp.int32),
        in_specs=[_VMEM] * 6,
        out_specs=_VMEM,
    )(state, deterministic, w1s, w1d, b1, wl)
    return idx[:, 0]


def init_params(key, state_size, deterministic_size, hidden_size, action_dim):
    """nn.Linear-style init (U(-1/sqrt(fan_in), +)), module's raw (W, b) form."""
    def linear(k, fan_in, fan_out):
        kw, kb = jax.random.split(k)
        bound = 1.0 / jnp.sqrt(fan_in)
        w = jax.random.uniform(kw, (fan_in, fan_out), jnp.float32, -bound, bound)
        b = jax.random.uniform(kb, (1, fan_out), jnp.float32, -bound, bound)
        return w, b

    k1, k2, k3 = jax.random.split(key, 3)
    w1, b1 = linear(k1, state_size + deterministic_size, hidden_size)
    w2, b2 = linear(k2, hidden_size, hidden_size)
    w3, b3 = linear(k3, hidden_size, action_dim)
    return (w1, b1, w2, b2, w3, b3)


def pack_params(raw_params, state_size):
    """One-time repack (call once outside jit):
       - split W1 by input (state / deterministic) so the kernel fuses the concat,
       - fold the activation-free Linear->Linear tail: W23 = W2@W3, b23 = b2@W3 + b3,
         packed into a single (H+1, A) buffer."""
    w1, b1, w2, b2, w3, b3 = raw_params
    w1s = w1[:state_size]                       # (S, H)
    w1d = w1[state_size:]                       # (D, H)
    w23 = w2 @ w3                               # (H, A) -- exact, no activation between
    b23 = b2 @ w3 + b3                          # (1, A)
    wl = jnp.concatenate([w23, b23], axis=0)    # (H+1, A)
    return (w1s, w1d, b1, wl)


def _reference_forward(packed_params, state, deterministic, gumbel, training):
    """Pure-JAX reference on the same packed parameterization."""
    w1s, w1d, b1, wl = packed_params
    h = state @ w1s + deterministic @ w1d + b1
    h = jnp.where(h > 0, h, jnp.exp(jnp.minimum(h, 0.0)) - 1.0)
    logits = h @ wl[:-1] + wl[-1:]
    if training:
        idx = jnp.argmax(logits + gumbel, axis=-1)
        sample = jax.nn.one_hot(idx, logits.shape[-1], dtype=jnp.float32)
        probs = jax.nn.softmax(logits, axis=-1)
        return sample + probs - jax.lax.stop_gradient(probs)
    return jnp.argmax(logits, axis=-1).astype(jnp.int32)


if __name__ == "__main__":
    B = 8
    STATE_SIZE = 30
    DETERMINISTIC_SIZE = 34
    HIDDEN_SIZE = 32
    ACTION_DIM = 6

    key = jax.random.PRNGKey(0)
    kp, ks, kd, ksample = jax.random.split(key, 4)

    raw = init_params(kp, STATE_SIZE, DETERMINISTIC_SIZE, HIDDEN_SIZE, ACTION_DIM)
    packed = pack_params(raw, STATE_SIZE)

    state = jax.random.normal(ks, (B, STATE_SIZE), jnp.float32)
    deterministic = jax.random.normal(kd, (B, DETERMINISTIC_SIZE), jnp.float32)

    # --- training path: straight-through one-hot sample ---------------------
    action = action_discrete_forward(packed, state, deterministic, ksample, training=True)
    action = jax.block_until_ready(action)
    assert action.shape == (B, ACTION_DIM)
    assert bool(jnp.all(jnp.abs(jnp.sum(action, axis=-1) - 1.0) < 1e-5))
    gumbel = jax.random.gumbel(ksample, (B, ACTION_DIM), dtype=jnp.float32)
    ref_action = _reference_forward(packed, state, deterministic, gumbel, training=True)
    assert bool(jnp.all(jnp.abs(action - ref_action) < 1e-5))

    # --- eval path: argmax indices ------------------------------------------
    idx = action_discrete_forward(packed, state, deterministic, ksample, training=False)
    idx = jax.block_until_ready(idx)
    assert idx.shape == (B,)
    ref_idx = _reference_forward(packed, state, deterministic, None, training=False)
    assert bool(jnp.all(idx == ref_idx))

    print("KERNEL_OK")
</pallas_src>

<mosaic_0001>
module attributes {stable_mosaic.version = 11 : i64} {
  func.func @actor_train_kernel(%arg0: memref<8x30xf32, #tpu.memory_space<vmem>>, %arg1: memref<8x34xf32, #tpu.memory_space<vmem>>, %arg2: memref<8x6xf32, #tpu.memory_space<vmem>>, %arg3: memref<30x32xf32, #tpu.memory_space<vmem>>, %arg4: memref<34x32xf32, #tpu.memory_space<vmem>>, %arg5: memref<1x32xf32, #tpu.memory_space<vmem>>, %arg6: memref<33x6xf32, #tpu.memory_space<vmem>>, %arg7: memref<8x6xf32, #tpu.memory_space<vmem>>, %arg8: memref<8x6xf32, #tpu.memory_space<vmem>>) attributes {dimension_semantics = [], scalar_prefetch = 0 : i64, scratch_operands = 0 : i64, tpu.core_type = #tpu.core_type<tc>} {
    %c0 = arith.constant 0 : index
    %c0_0 = arith.constant 0 : index
    %0 = vector.load %arg0[%c0, %c0_0] : memref<8x30xf32, #tpu.memory_space<vmem>>, vector<8x30xf32>
    %c0_1 = arith.constant 0 : index
    %c0_2 = arith.constant 0 : index
    %1 = vector.load %arg3[%c0_1, %c0_2] : memref<30x32xf32, #tpu.memory_space<vmem>>, vector<30x32xf32>
    %cst = arith.constant dense<0.000000e+00> : vector<8x32xf32>
    %2 = tpu.matmul %0, %1, %cst {dimension_numbers = #tpu.dot_dimension_numbers<[1], [0], [0], [1], [0, 0, 1, 1], [], []>} : vector<8x30xf32>, vector<30x32xf32>, vector<8x32xf32> -> vector<8x32xf32>
    %c0_3 = arith.constant 0 : index
    %c0_4 = arith.constant 0 : index
    %3 = vector.load %arg1[%c0_3, %c0_4] : memref<8x34xf32, #tpu.memory_space<vmem>>, vector<8x34xf32>
    %c0_5 = arith.constant 0 : index
    %c0_6 = arith.constant 0 : index
    %4 = vector.load %arg4[%c0_5, %c0_6] : memref<34x32xf32, #tpu.memory_space<vmem>>, vector<34x32xf32>
    %cst_7 = arith.constant dense<0.000000e+00> : vector<8x32xf32>
    %5 = tpu.matmul %3, %4, %cst_7 {dimension_numbers = #tpu.dot_dimension_numbers<[1], [0], [0], [1], [0, 0, 1, 1], [], []>} : vector<8x34xf32>, vector<34x32xf32>, vector<8x32xf32> -> vector<8x32xf32>
    %6 = arith.addf %2, %5 : vector<8x32xf32>
    %c0_8 = arith.constant 0 : index
    %c0_9 = arith.constant 0 : index
    %7 = vector.load %arg5[%c0_8, %c0_9] : memref<1x32xf32, #tpu.memory_space<vmem>>, vector<1x32xf32>
    %8 = vector.broadcast %7 : vector<1x32xf32> to vector<8x32xf32>
    %9 = arith.addf %6, %8 : vector<8x32xf32>
    %cst_10 = arith.constant 0.000000e+00 : f32
    %10 = vector.broadcast %cst_10 : f32 to vector<8x32xf32>
    %11 = arith.cmpf ogt, %9, %10 : vector<8x32xf32>
    %cst_11 = arith.constant 0.000000e+00 : f32
    %12 = vector.broadcast %cst_11 : f32 to vector<8x32xf32>
    %13 = arith.minimumf %9, %12 : vector<8x32xf32>
    %14 = math.exp %13 : vector<8x32xf32>
    %cst_12 = arith.constant 1.000000e+00 : f32
    %15 = vector.broadcast %cst_12 : f32 to vector<8x32xf32>
    %16 = arith.subf %14, %15 : vector<8x32xf32>
    %17 = arith.select %11, %9, %16 : vector<8x32xi1>, vector<8x32xf32>
    %c0_13 = arith.constant 0 : index
    %c0_14 = arith.constant 0 : index
    %18 = vector.load %arg6[%c0_13, %c0_14] : memref<33x6xf32, #tpu.memory_space<vmem>>, vector<32x6xf32>
    %c32 = arith.constant 32 : index
    %c0_15 = arith.constant 0 : index
    %19 = vector.load %arg6[%c32, %c0_15] : memref<33x6xf32, #tpu.memory_space<vmem>>, vector<1x6xf32>
    %cst_16 = arith.constant dense<0.000000e+00> : vector<8x6xf32>
    %20 = tpu.matmul %17, %18, %cst_16 {dimension_numbers = #tpu.dot_dimension_numbers<[1], [0], [0], [1], [0, 0, 1, 1], [], []>} : vector<8x32xf32>, vector<32x6xf32>, vector<8x6xf32> -> vector<8x6xf32>
    %21 = vector.broadcast %19 : vector<1x6xf32> to vector<8x6xf32>
    %22 = arith.addf %20, %21 : vector<8x6xf32>
    %cst_17 = arith.constant dense<0xFF800000> : vector<8xf32>
    %23 = vector.multi_reduction <maximumf>, %22, %cst_17 [1] : vector<8x6xf32> to vector<8xf32>
    %24 = vector.shape_cast %23 : vector<8xf32> to vector<8x1xf32>
    %25 = vector.broadcast %24 : vector<8x1xf32> to vector<8x6xf32>
    %26 = arith.subf %22, %25 : vector<8x6xf32>
    %27 = math.exp %26 : vector<8x6xf32>
    %cst_18 = arith.constant dense<0.000000e+00> : vector<8xf32>
    %28 = vector.multi_reduction <add>, %27, %cst_18 [1] : vector<8x6xf32> to vector<8xf32>
    %29 = vector.shape_cast %28 : vector<8xf32> to vector<8x1xf32>
    %30 = vector.broadcast %29 : vector<8x1xf32> to vector<8x6xf32>
    %31 = arith.divf %27, %30 : vector<8x6xf32>
    %c0_19 = arith.constant 0 : index
    %c0_20 = arith.constant 0 : index
    %32 = vector.load %arg2[%c0_19, %c0_20] : memref<8x6xf32, #tpu.memory_space<vmem>>, vector<8x6xf32>
    %33 = arith.addf %22, %32 : vector<8x6xf32>
    %cst_21 = arith.constant dense<0xFF800000> : vector<8xf32>
    %34 = vector.multi_reduction <maximumf>, %33, %cst_21 [1] : vector<8x6xf32> to vector<8xf32>
    %35 = vector.shape_cast %34 : vector<8xf32> to vector<8x1xf32>
    %36 = tpu.iota {dimensions = array<i32: 1>} : vector<8x6xi32>
    %37 = vector.broadcast %35 : vector<8x1xf32> to vector<8x6xf32>
    %38 = arith.cmpf oeq, %33, %37 : vector<8x6xf32>
    %c6_i32 = arith.constant 6 : i32
    %39 = vector.broadcast %c6_i32 : i32 to vector<8x6xi32>
    %40 = arith.select %38, %36, %39 : vector<8x6xi1>, vector<8x6xi32>
    %cst_22 = arith.constant dense<2147483647> : vector<8xi32>
    %41 = vector.multi_reduction <minsi>, %40, %cst_22 [1] : vector<8x6xi32> to vector<8xi32>
    %42 = vector.shape_cast %41 : vector<8xi32> to vector<8x1xi32>
    %43 = vector.broadcast %42 : vector<8x1xi32> to vector<8x6xi32>
    %44 = arith.cmpi eq, %36, %43 : vector<8x6xi32>
    %45 = arith.extui %44 : vector<8x6xi1> to vector<8x6xi32>
    %46 = arith.sitofp %45 : vector<8x6xi32> to vector<8x6xf32>
    %c0_23 = arith.constant 0 : index
    %c0_24 = arith.constant 0 : index
    %47 = vector.load %arg7[%c0_23, %c0_24] : memref<8x6xf32, #tpu.memory_space<vmem>>, vector<8x6xf32>
    tpu.vector_store %arg7[%c0_23, %c0_24], %46 {strides = array<i32>} : memref<8x6xf32, #tpu.memory_space<vmem>>, vector<8x6xf32>,
    %c0_25 = arith.constant 0 : index
    %c0_26 = arith.constant 0 : index
    %48 = vector.load %arg8[%c0_25, %c0_26] : memref<8x6xf32, #tpu.memory_space<vmem>>, vector<8x6xf32>
    tpu.vector_store %arg8[%c0_25, %c0_26], %31 {strides = array<i32>} : memref<8x6xf32, #tpu.memory_space<vmem>>, vector<8x6xf32>,
    return
  }
}

</mosaic_0001>

<bundles_post_ra>
// kernel: action_discrete_forward.1
= control target key start
LH: loop header
LB: loop body
LE: loop exit
PB: predicated region body
PF: predicated region fallthrough
CT: control target
= control target key end

     0   :  { %vm43_vm0 = vcmask 1041408   ;;  %vm71_vm1 = vcmask 1045504   ;;  %vm67_vm2 = vcmask 244736   ;;  %vm39_vm3 = vcmask 277504   ;;  %s326_s4 = inlined_call_operand.vmem [shape: f32[34,32], index: 4, kind: input, shape index: {}]   ;;  %s327_s3 = inlined_call_operand.vmem [shape: f32[30,32], index: 3, kind: input, shape index: {}]   ;;  %s328_s0 = inlined_call_operand.vmem [shape: f32[8,30], index: 0, kind: input, shape index: {}]   ;;  %s329_s1 = inlined_call_operand.vmem [shape: f32[8,34], index: 1, kind: input, shape index: {}]   ;;  %s330_s5 = inlined_call_operand.vmem [shape: f32[1,32], index: 5, kind: input, shape index: {}]   ;;  %s331_s6 = inlined_call_operand.vmem [shape: f32[33,6], index: 6, kind: input, shape index: {}]   ;;  %s332_s2 = inlined_call_operand.vmem [shape: f32[8,6], index: 2, kind: input, shape index: {}]   ;;  %s333_s8 = inlined_call_operand.vmem [shape: f32[8,6], index: 8, kind: output, shape index: {1}]   ;;  %s334_s7 = inlined_call_operand.vmem [shape: f32[8,6], index: 7, kind: output, shape index: {0}]  }
   0x1   :  { %v38_v0 = vld [vmem:[%s326_s4 + $0x20] sm:$0x3]  ;;  %v37_v1 = vld [vmem:[%s326_s4 + $0x18] sm:$0xff]  ;;  %v31_v3 = vld [vmem:[%s327_s3 + $0x10] sm:$0xff]  ;;  %vm112_vm4 = vcmask 261120   ;;  %vm136_vm6 = vcmask 48128   ;;  %v166_v32 = vlaneseq }
   0x2   :  { %v32_v2 = vld [vmem:[%s327_s3 + $0x18] sm:$0x3f]  ;;  %198 = vmatpush.msk.msra.mxu0 %vm43_vm0, %v38_v0  ;;  %v36_v4 = vld [vmem:[%s326_s4 + $0x10] sm:$0xff]  ;;  %v30_v5 = vld [vmem:[%s327_s3 + $0x8] sm:$0xff] }
   0x3   :  { %200 = vmatpush.msk.msra.mxu1 %vm71_vm1, %v32_v2  ;;  %v35_v6 = vld [vmem:[%s326_s4 + $0x8] sm:$0xff]  ;;  %v29_v7 = vld [vmem:[%s327_s3] sm:$0xff]  ;;  %v109_v11 = vld [vmem:[%s331_s6 + $0x18] sm:$0xff]  ;;  %v167_v33 = vand.u32 127, %v166_v32 }
   0x4   :  { %59 = vmatpush.msra.mxu0 %v37_v1  ;;  %v28_v8 = vld [vmem:[%s328_s0] sm:$0xff]  ;;  %v108_v12 = vld [vmem:[%s331_s6 + $0x10] sm:$0xff]  ;;  %128 = vmatpush.msra.mxu2 %v109_v11  ;;  %v107_v13 = vld [vmem:[%s331_s6 + $0x8] sm:$0xff]  ;;  %v214_v1 = vmov 0.0  }
   0x5   :  { %88 = vmatpush.msra.mxu1 %v31_v3  ;;  %v34_v9 = vld [vmem:[%s326_s4] sm:$0xff] }
   0x6   :  { %60 = vmatpush.msra.mxu0 %v36_v4  ;;  %v33_v10 = vld [vmem:[%s329_s1] sm:$0xff]  ;;  %129 = vmatpush.msra.mxu2 %v108_v12 }
   0x7   :  { %89 = vmatpush.msra.mxu1 %v30_v5  ;;  %v106_v14 = vld [vmem:[%s331_s6] sm:$0xff] }
   0x8   :  { %61 = vmatpush.msra.mxu0 %v35_v6  ;;  %130 = vmatpush.msra.mxu2 %v107_v13  ;;  %v206_v16 = vld [vmem:[%s330_s5] ss:$0 sm:$0xff] }
   0x9   :  { %90 = vmatpush.msra.mxu1 %v29_v7  ;;  %v207_v25 = vld [vmem:[%s331_s6 + $0x20] ss:$0 sm:$0xff] }
   0xa   :  { %201 = vmatmul.msk.f32.vlgmr.msra.gmra.mxu1 %vm67_vm2, %v28_v8  ;;  %62 = vmatpush.msra.mxu0 %v34_v9  ;;  %v161_v27 = vld [vmem:[%s332_s2] sm:$0xff] }
   0xb   :  { %199 = vmatmul.msk.f32.vlgmr.msra.gmra.mxu0 %vm39_vm3, %v33_v10  ;;  %131 = vmatpush.msra.mxu2 %v106_v14 }
  0x87   :  { %v92_v15 = vpop.f32.mrf.mxu1 }
  0x88   :  { %v64_v17 = vpop.f32.mrf.mxu0 }
  0x89   :  { %v93_v18 = vadd.f32 %v92_v15, %v64_v17 }
  0x8b   :  { %v99_v19 = vadd.f32 %v206_v16, %v93_v18 }
  0x8d   :  { %v101_v20 = vmin.f32 %v99_v19, 0.0  ;;  %vm100_vm5 = vcmp.gt.f32.partialorder %v99_v19, 0.0 }
  0x8f   :  { %v102_v21 = vmul.f32 1.442695, %v101_v20 }
  0x91   :  { %208 = vpow2.f32 %v102_v21 }
  0x97   :  { %v209_v22 = vpop.eup %208 }
  0x98   :  { %v202_v23 = vadd.f32 -1.0, %v209_v22 }
  0x9a   :  { %v105_v24 = vsel %vm100_vm5, %v99_v19, %v202_v23 }
  0x9b   :  { %203 = vmatmul.msk.f32.vlgmr.msra.gmra.mxu2 %vm112_vm4, %v105_v24 }
 0x11e   :  { %v133_v26 = vpop.f32.mrf.mxu2 }
 0x11f   :  { %v134_v28 = vadd.f32 %v207_v25, %v133_v26 }
 0x121   :  { %v162_v29 = vadd.f32 %v161_v27, %v134_v28  ;;  %v137_v31 = vsel %vm136_vm6, %v134_v28, -inf }
 0x123   :  { %v163_v30 = vsel %vm136_vm6, %v162_v29, -inf }
 0x124   :  { %164 = vmax.xlane.f32.xlu0 %v163_v30 }
 0x12c   :  { %138 = vmax.xlane.f32.xlu0 %v137_v31 }
 0x197   :  { %v165_v34 = vpop.xlane.xlu0 %164 }
 0x198   :  { %vm168_vm7 = vcmp.eq.f32.partialorder %v162_v29, %v165_v34 }
 0x199   :  { %v169_v35 = vsel %vm168_vm7, %v167_v33, 6 }
 0x19a   :  { %v170_v36 = vsel %vm136_vm6, %v169_v35, 2147483647 }
 0x19b   :  { %v172_v37 = vshra.s32 %v170_v36, 16  ;;  %v171_v44 = vand.u32 65535, %v170_v36 }
 0x19d   :  { %v174_v38 = vcvt.s32.f32 %v172_v37  ;;  %v173_v46 = vcvt.s32.f32 %v171_v44 }
 0x19f   :  { %175 = vmin.xlane.f32.xlu1 %v174_v38  ;;  %v139_v39 = vpop.xlane.xlu0 %138 }
 0x1a0   :  { %v140_v40 = vsub.f32 %v134_v28, %v139_v39 }
 0x1a2   :  { %v141_v41 = vmul.f32 1.442695, %v140_v40 }
 0x1a4   :  { %210 = vpow2.f32 %v141_v41 }
 0x1aa   :  { %v211_v42 = vpop.eup %210 }
 0x1ab   :  { %v143_v43 = vsel %vm136_vm6, %v211_v42, 0.0 }
 0x1ac   :  { %144 = vadd.xlane.f32.xlu1 %v143_v43 }
 0x212   :  { %v176_v45 = vpop.xlane.xlu1 %175 }
 0x213   :  { %vm177_vm8 = vcmp.eq.f32.partialorder %v174_v38, %v176_v45  ;;  %v182_v60 = vcvt.f32.s32 %v176_v45 }
 0x214   :  { %v178_v47 = vsel %vm177_vm8, %v173_v46, inf }
 0x215   :  { %179 = vmin.xlane.f32.xlu2 %v178_v47  ;;  %v183_v62 = vshll.u32 %v182_v60, 16 }
 0x21f   :  { %v145_v48 = vpop.xlane.xlu1 %144 }
 0x220   :  { %212 = vrcp.f32 %v145_v48  ;;  %v157_v52 = vand.u32 2147483648, %v145_v48  ;;  %v155_v54 = vand.u32 2147483647, %v145_v48  ;;  %vm151_vm10 = vweird.f32 %v145_v48 }
 0x222   :  { %v158_v56 = vor.u32 1.1754944e-38, %v157_v52  ;;  %vm156_vm12 = vcmp.eq.f32.partialorder %v155_v54, 8.507059e+37 }
 0x226   :  { %v213_v49 = vpop.eup %212 }
 0x227   :  { %v147_v50 = vmul.f32 %v213_v49, %v145_v48  ;;  %vm152_vm9 = vweird.f32 %v213_v49 }
 0x228   :  { %vm153_vm11 = vmor %vm151_vm10, %vm152_vm9 }
 0x229   :  { %v148_v51 = vsub.f32 1.0, %v147_v50 }
 0x22b   :  { %v149_v53 = vmul.f32 %v213_v49, %v148_v51 }
 0x22d   :  { %v150_v55 = vadd.f32 %v213_v49, %v149_v53 }
 0x22f   :  { %v154_v57 = vsel %vm153_vm11, %v213_v49, %v150_v55 }
 0x230   :  { %v159_v58 = vsel %vm156_vm12, %v158_v56, %v154_v57 }
 0x231   :  { %v160_v59 = vmul.f32 %v211_v42, %v159_v58 }
 0x233   :  { %189 = vst.msk [vmem:[%s333_s8] sm:$0xff] %vm136_vm6, %v160_v59 }
 0x288   :  { %v180_v61 = vpop.xlane.xlu2 %179 }
 0x289   :  { %v181_v63 = vcvt.f32.s32 %v180_v61 }
 0x28b   :  { %v184_v0 = vadd.s32 %v183_v62, %v181_v63 }
 0x28d   :  { %vm185_vm13 = vcmp.eq.s32.totalorder %v167_v33, %v184_v0 }
 0x28e   :  { %v204_v2 = vsel %vm185_vm13, 1.0, %v214_v1 }
 0x28f   :  { %188 = vst.msk [vmem:[%s334_s7] sm:$0xff] %vm136_vm6, %v204_v2 }

</bundles_post_ra>
